<compile_context>
chip_gen: v7x
topology: tpu7x:2x2x1
jax: 0.10.0
libtpu: 0.0.40
codegen_flags: <defaults>
</compile_context>

<pallas_src>
import math

import jax
import jax.numpy as jnp
from jax.experimental import pallas as pl
from jax.experimental.pallas import tpu as pltpu


_INV_SQRT2 = 1.0 / math.sqrt(2.0)


def _gelu_exact(x):
    # nn.GELU() default = exact (erf-based) GELU.
    return 0.5 * x * (1.0 + jax.lax.erf(x * _INV_SQRT2))


def _round_up(n, m):
    return ((n + m - 1) // m) * m


def lgc_encoder_kernel(
    x_ref,      # (1, C, Np) f32  slab = [x.flatten(H*W) | cls.flatten(k*k) | 0-pad]
    cvec_ref,   # (C, 6)    f32  cols: la1 scale, la1 shift, la2 scale, la2 shift,
                #                      conv_out bias, mlp-conv2 bias
    win_ref,    # (HID, C)  bf16 local_conv_in 1x1 weight
    bin_ref,    # (HID, 1)  f32  local_conv_in bias
    nvec_ref,   # (HID//2, 2) f32 attention-norm (BN inference) scale, shift
    wg_ref,     # (Np, Np)  bf16 global_transform weight, zero-padded, y = z @ wg
    bg_ref,     # (1, Np)   f32  global_transform bias, zero-padded
    wout_ref,   # (C, HID//2) bf16 local_conv_out 1x1 weight
    wm1_ref,    # (MLP, C)  bf16 mlp conv1 1x1 weight
    bm1_ref,    # (MLP, 1)  f32  mlp conv1 bias
    wm2_ref,    # (C, MLP)  bf16 mlp conv2 1x1 weight
    o_ref,      # (1, C, Np)
):
    x = x_ref[0]                                   # (C, Np) f32, pre-norm input
    cv = cvec_ref[...]
    s1, sh1 = cv[:, 0:1], cv[:, 1:2]
    s2, sh2 = cv[:, 2:3], cv[:, 3:4]
    b_out, b_m2 = cv[:, 4:5], cv[:, 5:6]

    # ---------- la1 (BatchNorm2d, inference -> per-channel affine) ----------
    h = x * s1 + sh1

    # ---------- LocalGlobalConvolution ----------
    # local_conv_in (1x1) + GELU, applied jointly to image + cls slab.
    a = jnp.dot(win_ref[...], h.astype(jnp.bfloat16),
                preferred_element_type=jnp.float32) + bin_ref[...]
    a = _gelu_exact(a)                             # (HID, Np)
    hh = a.shape[0] // 2
    z1 = a[:hh]                                    # first half channels (sublane-aligned)
    z2 = a[hh:]                                    # second half channels

    nv = nvec_ref[...]
    z2 = z2 * nv[:, 0:1] + nv[:, 1:2]              # self.norm (BN inference affine)

    # global_transform: Linear over the concatenated spatial+cls axis.
    # Pad rows/cols of wg are zero, so pad lanes of z2 contribute nothing and
    # output pad lanes stay zero.
    z2 = jnp.dot(z2.astype(jnp.bfloat16), wg_ref[...],
                 preferred_element_type=jnp.float32) + bg_ref[...]   # (hh, Np)

    g = z1 * z2                                    # gating (covers x AND cls paths)
    att = jnp.dot(wout_ref[...], g.astype(jnp.bfloat16),
                  preferred_element_type=jnp.float32) + b_out        # local_conv_out
    out1 = att + x                                 # residual 1

    # ---------- la2 + MLP (1x1 conv -> GELU -> 1x1 conv -> GELU) ----------
    h2 = out1 * s2 + sh2
    m = jnp.dot(wm1_ref[...], h2.astype(jnp.bfloat16),
                preferred_element_type=jnp.float32) + bm1_ref[...]
    m = _gelu_exact(m)
    m = jnp.dot(wm2_ref[...], m.astype(jnp.bfloat16),
                preferred_element_type=jnp.float32) + b_m2
    m = _gelu_exact(m)

    o_ref[0] = (m + out1).astype(o_ref.dtype)      # residual 2


def lgc_encoder(x, cls_token, params):
    """x: (B, C, H, W) f32, cls_token: (B, C, k, k) f32 -> (x_out, cls_out)."""
    B, C, H, W = x.shape
    kh, kw = cls_token.shape[-2], cls_token.shape[-1]
    S, K2 = H * W, kh * kw
    N = S + K2
    Np = _round_up(N, 128)          # lane-dense / MXU-aligned width

    # Single slab per batch element (image spatial then cls spatial), matching
    # the module's own cat([z2.flatten(-2), cls2.flatten(-2)], -1).
    slab = jnp.concatenate(
        [x.reshape(B, C, S), cls_token.reshape(B, C, K2)], axis=-1)   # (B, C, N)
    w_g, b_g = params["w_g"], params["b_g"]
    if Np != N:
        slab = jnp.pad(slab, ((0, 0), (0, 0), (0, Np - N)))
        w_g = jnp.pad(w_g, ((0, Np - N), (0, Np - N)))
        b_g = jnp.pad(b_g, ((0, 0), (0, Np - N)))

    HID = params["w_in"].shape[0]
    MLP = params["w_m1"].shape[0]

    def full(shape):
        return pl.BlockSpec(shape, lambda b: (0,) * len(shape))

    out = pl.pallas_call(
        lgc_encoder_kernel,
        out_shape=jax.ShapeDtypeStruct((B, C, Np), x.dtype),
        grid_spec=pltpu.PrefetchScalarGridSpec(
            num_scalar_prefetch=0,
            grid=(B,),
            in_specs=[
                pl.BlockSpec((1, C, Np), lambda b: (b, 0, 0)),  # slab
                full((C, 6)),                                   # packed per-channel vecs
                full((HID, C)), full((HID, 1)),                 # conv_in W, b
                full((HID // 2, 2)),                            # attn-norm scale/shift
                full((Np, Np)), full((1, Np)),                  # global_transform W, b
                full((C, HID // 2)),                            # conv_out W
                full((MLP, C)), full((MLP, 1)),                 # mlp conv1 W, b
                full((C, MLP)),                                 # mlp conv2 W
            ],
            out_specs=pl.BlockSpec((1, C, Np), lambda b: (b, 0, 0)),
        ),
        compiler_params=pltpu.CompilerParams(
            dimension_semantics=("parallel",),   # batch shards across TensorCores
            vmem_limit_bytes=32 * 1024 * 1024,   # explicit budget; tiny usage here
        ),
    )(
        slab,
        params["cvec"],
        params["w_in"], params["b_in"],
        params["nvec"],
        w_g, b_g,
        params["w_out"],
        params["w_m1"], params["b_m1"],
        params["w_m2"],
    )

    x_out = out[..., :S].reshape(B, C, H, W)
    cls_out = out[..., S:N].reshape(B, C, kh, kw)
    return x_out, cls_out


def lgc_encoder_reference(x, cls_token, params):
    """Pure-JAX reference with the same bf16-operand / f32-accumulate arithmetic."""
    B, C, H, W = x.shape
    kh, kw = cls_token.shape[-2], cls_token.shape[-1]
    S, K2 = H * W, kh * kw
    slab = jnp.concatenate(
        [x.reshape(B, C, S), cls_token.reshape(B, C, K2)], axis=-1)   # (B, C, N)

    cv = params["cvec"]
    s1, sh1 = cv[:, 0][None, :, None], cv[:, 1][None, :, None]
    s2, sh2 = cv[:, 2][None, :, None], cv[:, 3][None, :, None]
    b_out, b_m2 = cv[:, 4][None, :, None], cv[:, 5][None, :, None]
    nv = params["nvec"]

    def pconv(w, h):  # 1x1 conv over channels, MXU-style bf16 x bf16 -> f32
        return jnp.einsum('oi,bin->bon', w, h.astype(jnp.bfloat16),
                          preferred_element_type=jnp.float32)

    gelu = lambda t: 0.5 * t * (1.0 + jax.lax.erf(t * _INV_SQRT2))

    h = slab * s1 + sh1
    a = gelu(pconv(params["w_in"], h) + params["b_in"][None])
    hh = a.shape[1] // 2
    z1, z2 = a[:, :hh], a[:, hh:]
    z2 = z2 * nv[:, 0][None, :, None] + nv[:, 1][None, :, None]
    z2 = jnp.einsum('bhn,nm->bhm', z2.astype(jnp.bfloat16), params["w_g"],
                    preferred_element_type=jnp.float32) + params["b_g"][None]
    g = z1 * z2
    att = pconv(params["w_out"], g) + b_out
    out1 = att + slab
    h2 = out1 * s2 + sh2
    m = gelu(pconv(params["w_m1"], h2) + params["b_m1"][None])
    m = gelu(pconv(params["w_m2"], m) + b_m2)
    out = m + out1
    return out[..., :S].reshape(B, C, H, W), out[..., S:].reshape(B, C, kh, kw)


def init_params(key, features, hidden, mlp_hidden, n_tokens):
    ks = jax.random.split(key, 14)
    f32, bf16 = jnp.float32, jnp.bfloat16
    s = 0.05
    hh = hidden // 2

    def w(k, shape):
        # MXU-facing weights stored in bf16 (halves weight DMA / VMEM footprint).
        return (s * jax.random.normal(k, shape, f32)).astype(bf16)

    # BatchNorm2d (inference) folded to per-channel scale/shift.
    cvec = jnp.stack(
        [
            1.0 + 0.1 * jax.random.normal(ks[0], (features,), f32),  # la1 scale
            0.05 * jax.random.normal(ks[1], (features,), f32),       # la1 shift
            1.0 + 0.1 * jax.random.normal(ks[2], (features,), f32),  # la2 scale
            0.05 * jax.random.normal(ks[3], (features,), f32),       # la2 shift
            0.05 * jax.random.normal(ks[4], (features,), f32),       # conv_out bias
            0.05 * jax.random.normal(ks[5], (features,), f32),       # mlp conv2 bias
        ],
        axis=-1,
    )                                                                 # (features, 6)
    nvec = jnp.stack(
        [
            1.0 + 0.1 * jax.random.normal(ks[6], (hh,), f32),         # attn-norm scale
            0.05 * jax.random.normal(ks[7], (hh,), f32),              # attn-norm shift
        ],
        axis=-1,
    )                                                                 # (hh, 2)

    return {
        "cvec": cvec,
        "nvec": nvec,
        "w_in": w(ks[8], (hidden, features)),            # local_conv_in (1x1)
        "b_in": 0.05 * jax.random.normal(ks[9], (hidden, 1), f32),
        # global_transform Linear(N, N), stored so the kernel does z @ w_g.
        "w_g": w(ks[10], (n_tokens, n_tokens)),
        "b_g": 0.05 * jax.random.normal(ks[11], (1, n_tokens), f32),
        "w_out": w(ks[12], (features, hh)),              # local_conv_out (1x1)
        "w_m1": w(ks[13], (mlp_hidden, features)),       # mlp conv1 (1x1)
        "b_m1": jnp.zeros((mlp_hidden, 1), f32),
        "w_m2": w(jax.random.fold_in(key, 99), (features, mlp_hidden)),  # mlp conv2
    }


if __name__ == "__main__":
    B = 2
    FEATURES = 8          # input_shapes[0]
    H = W = 16            # input_shapes[-2], input_shapes[-1]
    HIDDEN = 16           # hidden_features (chunked into two halves of 8)
    KSIZE = 1             # kernel_size (1x1 convs)
    MLP_HIDDEN = 32

    key = jax.random.PRNGKey(0)
    kx, kc, kp = jax.random.split(key, 3)
    x = jax.random.normal(kx, (B, FEATURES, H, W), jnp.float32)
    cls_token = jax.random.normal(kc, (B, FEATURES, KSIZE, KSIZE), jnp.float32)
    params = init_params(kp, FEATURES, HIDDEN, MLP_HIDDEN, H * W + KSIZE * KSIZE)

    x_out, cls_out = lgc_encoder(x, cls_token, params)
    x_out = jax.block_until_ready(x_out)
    cls_out = jax.block_until_ready(cls_out)

    assert x_out.shape == (B, FEATURES, H, W)
    assert cls_out.shape == (B, FEATURES, KSIZE, KSIZE)
    assert bool(jnp.all(jnp.isfinite(x_out)))
    assert bool(jnp.all(jnp.isfinite(cls_out)))

    # Correctness vs. pure-JAX reference using the same bf16/f32 arithmetic.
    x_ref, cls_ref = lgc_encoder_reference(x, cls_token, params)
    err_x = float(jnp.max(jnp.abs(x_out - x_ref)))
    err_c = float(jnp.max(jnp.abs(cls_out - cls_ref)))
    assert err_x < 2e-2 and err_c < 2e-2, (err_x, err_c)

    print("KERNEL_OK")
</pallas_src>

<mosaic_0001>
module attributes {stable_mosaic.version = 11 : i64} {
  func.func @lgc_encoder_kernel(%arg0: i32, %arg1: memref<1x8x384xf32, #tpu.memory_space<vmem>>, %arg2: memref<8x6xf32, #tpu.memory_space<vmem>>, %arg3: memref<16x8xbf16, #tpu.memory_space<vmem>>, %arg4: memref<16x1xf32, #tpu.memory_space<vmem>>, %arg5: memref<8x2xf32, #tpu.memory_space<vmem>>, %arg6: memref<384x384xbf16, #tpu.memory_space<vmem>>, %arg7: memref<1x384xf32, #tpu.memory_space<vmem>>, %arg8: memref<8x8xbf16, #tpu.memory_space<vmem>>, %arg9: memref<32x8xbf16, #tpu.memory_space<vmem>>, %arg10: memref<32x1xf32, #tpu.memory_space<vmem>>, %arg11: memref<8x32xbf16, #tpu.memory_space<vmem>>, %arg12: memref<1x8x384xf32, #tpu.memory_space<vmem>>) attributes {dimension_semantics = [#tpu.dimension_semantics<parallel>], iteration_bounds = array<i64: 2>, scalar_prefetch = 0 : i64, scratch_operands = 0 : i64, tpu.core_type = #tpu.core_type<tc>, window_params = [{transform_indices = @transform_0, window_bounds = array<i64: 1, 8, 384>}, {pipeline_mode = #tpu.pipeline_mode<synchronous>, transform_indices = @transform_1, window_bounds = array<i64: 8, 6>}, {pipeline_mode = #tpu.pipeline_mode<synchronous>, transform_indices = @transform_2, window_bounds = array<i64: 16, 8>}, {pipeline_mode = #tpu.pipeline_mode<synchronous>, transform_indices = @transform_3, window_bounds = array<i64: 16, 1>}, {pipeline_mode = #tpu.pipeline_mode<synchronous>, transform_indices = @transform_4, window_bounds = array<i64: 8, 2>}, {pipeline_mode = #tpu.pipeline_mode<synchronous>, transform_indices = @transform_5, window_bounds = array<i64: 384, 384>}, {pipeline_mode = #tpu.pipeline_mode<synchronous>, transform_indices = @transform_6, window_bounds = array<i64: 1, 384>}, {pipeline_mode = #tpu.pipeline_mode<synchronous>, transform_indices = @transform_7, window_bounds = array<i64: 8, 8>}, {pipeline_mode = #tpu.pipeline_mode<synchronous>, transform_indices = @transform_8, window_bounds = array<i64: 32, 8>}, {pipeline_mode = #tpu.pipeline_mode<synchronous>, transform_indices = @transform_9, window_bounds = array<i64: 32, 1>}, {pipeline_mode = #tpu.pipeline_mode<synchronous>, transform_indices = @transform_10, window_bounds = array<i64: 8, 32>}, {transform_indices = @transform_11, window_bounds = array<i64: 1, 8, 384>}]} {
    %c0 = arith.constant 0 : index
    %c0_0 = arith.constant 0 : index
    %c0_1 = arith.constant 0 : index
    %0 = vector.load %arg1[%c0, %c0_0, %c0_1] : memref<1x8x384xf32, #tpu.memory_space<vmem>>, vector<1x8x384xf32>
    %1 = vector.shape_cast %0 : vector<1x8x384xf32> to vector<8x384xf32>
    %c0_2 = arith.constant 0 : index
    %c0_3 = arith.constant 0 : index
    %2 = vector.load %arg2[%c0_2, %c0_3] : memref<8x6xf32, #tpu.memory_space<vmem>>, vector<8x6xf32>
    %3 = vector.extract_strided_slice %2 {offsets = [0, 0], sizes = [8, 1], strides = [1, 1]} : vector<8x6xf32> to vector<8x1xf32>
    %4 = vector.extract_strided_slice %2 {offsets = [0, 1], sizes = [8, 1], strides = [1, 1]} : vector<8x6xf32> to vector<8x1xf32>
    %5 = vector.extract_strided_slice %2 {offsets = [0, 2], sizes = [8, 1], strides = [1, 1]} : vector<8x6xf32> to vector<8x1xf32>
    %6 = vector.extract_strided_slice %2 {offsets = [0, 3], sizes = [8, 1], strides = [1, 1]} : vector<8x6xf32> to vector<8x1xf32>
    %7 = vector.extract_strided_slice %2 {offsets = [0, 4], sizes = [8, 1], strides = [1, 1]} : vector<8x6xf32> to vector<8x1xf32>
    %8 = vector.extract_strided_slice %2 {offsets = [0, 5], sizes = [8, 1], strides = [1, 1]} : vector<8x6xf32> to vector<8x1xf32>
    %9 = vector.broadcast %3 : vector<8x1xf32> to vector<8x384xf32>
    %10 = arith.mulf %1, %9 : vector<8x384xf32>
    %11 = vector.broadcast %4 : vector<8x1xf32> to vector<8x384xf32>
    %12 = arith.addf %10, %11 : vector<8x384xf32>
    %c0_4 = arith.constant 0 : index
    %c0_5 = arith.constant 0 : index
    %13 = vector.load %arg3[%c0_4, %c0_5] : memref<16x8xbf16, #tpu.memory_space<vmem>>, vector<16x8xbf16>
    %14 = arith.truncf %12 : vector<8x384xf32> to vector<8x384xbf16>
    %cst = arith.constant dense<0.000000e+00> : vector<16x384xf32>
    %15 = tpu.matmul %13, %14, %cst {dimension_numbers = #tpu.dot_dimension_numbers<[1], [0], [0], [1], [0, 0, 1, 1], [], []>} : vector<16x8xbf16>, vector<8x384xbf16>, vector<16x384xf32> -> vector<16x384xf32>
    %c0_6 = arith.constant 0 : index
    %c0_7 = arith.constant 0 : index
    %16 = vector.load %arg4[%c0_6, %c0_7] : memref<16x1xf32, #tpu.memory_space<vmem>>, vector<16x1xf32>
    %17 = vector.broadcast %16 : vector<16x1xf32> to vector<16x384xf32>
    %18 = arith.addf %15, %17 : vector<16x384xf32>
    %cst_8 = arith.constant 5.000000e-01 : f32
    %19 = vector.broadcast %cst_8 : f32 to vector<16x384xf32>
    %20 = arith.mulf %19, %18 : vector<16x384xf32>
    %cst_9 = arith.constant 0.707106769 : f32
    %21 = vector.broadcast %cst_9 : f32 to vector<16x384xf32>
    %22 = arith.mulf %18, %21 : vector<16x384xf32>
    %23 = math.erf %22 : vector<16x384xf32>
    %cst_10 = arith.constant 1.000000e+00 : f32
    %24 = vector.broadcast %cst_10 : f32 to vector<16x384xf32>
    %25 = arith.addf %24, %23 : vector<16x384xf32>
    %26 = arith.mulf %20, %25 : vector<16x384xf32>
    %27 = vector.extract_strided_slice %26 {offsets = [0, 0], sizes = [8, 384], strides = [1, 1]} : vector<16x384xf32> to vector<8x384xf32>
    %28 = vector.extract_strided_slice %26 {offsets = [8, 0], sizes = [8, 384], strides = [1, 1]} : vector<16x384xf32> to vector<8x384xf32>
    %c0_11 = arith.constant 0 : index
    %c0_12 = arith.constant 0 : index
    %29 = vector.load %arg5[%c0_11, %c0_12] : memref<8x2xf32, #tpu.memory_space<vmem>>, vector<8x2xf32>
    %30 = vector.extract_strided_slice %29 {offsets = [0, 0], sizes = [8, 1], strides = [1, 1]} : vector<8x2xf32> to vector<8x1xf32>
    %31 = vector.broadcast %30 : vector<8x1xf32> to vector<8x384xf32>
    %32 = arith.mulf %28, %31 : vector<8x384xf32>
    %33 = vector.extract_strided_slice %29 {offsets = [0, 1], sizes = [8, 1], strides = [1, 1]} : vector<8x2xf32> to vector<8x1xf32>
    %34 = vector.broadcast %33 : vector<8x1xf32> to vector<8x384xf32>
    %35 = arith.addf %32, %34 : vector<8x384xf32>
    %36 = arith.truncf %35 : vector<8x384xf32> to vector<8x384xbf16>
    %c0_13 = arith.constant 0 : index
    %c0_14 = arith.constant 0 : index
    %37 = vector.load %arg6[%c0_13, %c0_14] : memref<384x384xbf16, #tpu.memory_space<vmem>>, vector<384x384xbf16>
    %cst_15 = arith.constant dense<0.000000e+00> : vector<8x384xf32>
    %38 = tpu.matmul %36, %37, %cst_15 {dimension_numbers = #tpu.dot_dimension_numbers<[1], [0], [0], [1], [0, 0, 1, 1], [], []>} : vector<8x384xbf16>, vector<384x384xbf16>, vector<8x384xf32> -> vector<8x384xf32>
    %c0_16 = arith.constant 0 : index
    %c0_17 = arith.constant 0 : index
    %39 = vector.load %arg7[%c0_16, %c0_17] : memref<1x384xf32, #tpu.memory_space<vmem>>, vector<1x384xf32>
    %40 = vector.broadcast %39 : vector<1x384xf32> to vector<8x384xf32>
    %41 = arith.addf %38, %40 : vector<8x384xf32>
    %42 = arith.mulf %27, %41 : vector<8x384xf32>
    %c0_18 = arith.constant 0 : index
    %c0_19 = arith.constant 0 : index
    %43 = vector.load %arg8[%c0_18, %c0_19] : memref<8x8xbf16, #tpu.memory_space<vmem>>, vector<8x8xbf16>
    %44 = arith.truncf %42 : vector<8x384xf32> to vector<8x384xbf16>
    %cst_20 = arith.constant dense<0.000000e+00> : vector<8x384xf32>
    %45 = tpu.matmul %43, %44, %cst_20 {dimension_numbers = #tpu.dot_dimension_numbers<[1], [0], [0], [1], [0, 0, 1, 1], [], []>} : vector<8x8xbf16>, vector<8x384xbf16>, vector<8x384xf32> -> vector<8x384xf32>
    %46 = vector.broadcast %7 : vector<8x1xf32> to vector<8x384xf32>
    %47 = arith.addf %45, %46 : vector<8x384xf32>
    %48 = arith.addf %47, %1 : vector<8x384xf32>
    %49 = vector.broadcast %5 : vector<8x1xf32> to vector<8x384xf32>
    %50 = arith.mulf %48, %49 : vector<8x384xf32>
    %51 = vector.broadcast %6 : vector<8x1xf32> to vector<8x384xf32>
    %52 = arith.addf %50, %51 : vector<8x384xf32>
    %c0_21 = arith.constant 0 : index
    %c0_22 = arith.constant 0 : index
    %53 = vector.load %arg9[%c0_21, %c0_22] : memref<32x8xbf16, #tpu.memory_space<vmem>>, vector<32x8xbf16>
    %54 = arith.truncf %52 : vector<8x384xf32> to vector<8x384xbf16>
    %cst_23 = arith.constant dense<0.000000e+00> : vector<32x384xf32>
    %55 = tpu.matmul %53, %54, %cst_23 {dimension_numbers = #tpu.dot_dimension_numbers<[1], [0], [0], [1], [0, 0, 1, 1], [], []>} : vector<32x8xbf16>, vector<8x384xbf16>, vector<32x384xf32> -> vector<32x384xf32>
    %c0_24 = arith.constant 0 : index
    %c0_25 = arith.constant 0 : index
    %56 = vector.load %arg10[%c0_24, %c0_25] : memref<32x1xf32, #tpu.memory_space<vmem>>, vector<32x1xf32>
    %57 = vector.broadcast %56 : vector<32x1xf32> to vector<32x384xf32>
    %58 = arith.addf %55, %57 : vector<32x384xf32>
    %cst_26 = arith.constant 5.000000e-01 : f32
    %59 = vector.broadcast %cst_26 : f32 to vector<32x384xf32>
    %60 = arith.mulf %59, %58 : vector<32x384xf32>
    %cst_27 = arith.constant 0.707106769 : f32
    %61 = vector.broadcast %cst_27 : f32 to vector<32x384xf32>
    %62 = arith.mulf %58, %61 : vector<32x384xf32>
    %63 = math.erf %62 : vector<32x384xf32>
    %cst_28 = arith.constant 1.000000e+00 : f32
    %64 = vector.broadcast %cst_28 : f32 to vector<32x384xf32>
    %65 = arith.addf %64, %63 : vector<32x384xf32>
    %66 = arith.mulf %60, %65 : vector<32x384xf32>
    %c0_29 = arith.constant 0 : index
    %c0_30 = arith.constant 0 : index
    %67 = vector.load %arg11[%c0_29, %c0_30] : memref<8x32xbf16, #tpu.memory_space<vmem>>, vector<8x32xbf16>
    %68 = arith.truncf %66 : vector<32x384xf32> to vector<32x384xbf16>
    %cst_31 = arith.constant dense<0.000000e+00> : vector<8x384xf32>
    %69 = tpu.matmul %67, %68, %cst_31 {dimension_numbers = #tpu.dot_dimension_numbers<[1], [0], [0], [1], [0, 0, 1, 1], [], []>} : vector<8x32xbf16>, vector<32x384xbf16>, vector<8x384xf32> -> vector<8x384xf32>
    %70 = vector.broadcast %8 : vector<8x1xf32> to vector<8x384xf32>
    %71 = arith.addf %69, %70 : vector<8x384xf32>
    %cst_32 = arith.constant 5.000000e-01 : f32
    %72 = vector.broadcast %cst_32 : f32 to vector<8x384xf32>
    %73 = arith.mulf %72, %71 : vector<8x384xf32>
    %cst_33 = arith.constant 0.707106769 : f32
    %74 = vector.broadcast %cst_33 : f32 to vector<8x384xf32>
    %75 = arith.mulf %71, %74 : vector<8x384xf32>
    %76 = math.erf %75 : vector<8x384xf32>
    %cst_34 = arith.constant 1.000000e+00 : f32
    %77 = vector.broadcast %cst_34 : f32 to vector<8x384xf32>
    %78 = arith.addf %77, %76 : vector<8x384xf32>
    %79 = arith.mulf %73, %78 : vector<8x384xf32>
    %80 = arith.addf %79, %48 : vector<8x384xf32>
    %c0_35 = arith.constant 0 : index
    %c0_36 = arith.constant 0 : index
    %c0_37 = arith.constant 0 : index
    %81 = vector.load %arg12[%c0_35, %c0_36, %c0_37] : memref<1x8x384xf32, #tpu.memory_space<vmem>>, vector<1x8x384xf32>
    %82 = vector.shape_cast %81 : vector<1x8x384xf32> to vector<8x384xf32>
    %83 = vector.shape_cast %80 : vector<8x384xf32> to vector<1x8x384xf32>
    tpu.vector_store %arg12[%c0_35, %c0_36, %c0_37], %83 {strides = array<i32>} : memref<1x8x384xf32, #tpu.memory_space<vmem>>, vector<1x8x384xf32>,
    return
  }
  func.func @transform_0(%arg0: i32) -> (i32, i32, i32) {
    %c0_i32 = arith.constant 0 : i32
    %c0_i32_0 = arith.constant 0 : i32
    %c0_i32_1 = arith.constant 0 : i32
    return %arg0, %c0_i32, %c0_i32_0 : i32, i32, i32
  }
  func.func @transform_1(%arg0: i32) -> (i32, i32) {
    %c0_i32 = arith.constant 0 : i32
    %c0_i32_0 = arith.constant 0 : i32
    %c0_i32_1 = arith.constant 0 : i32
    return %c0_i32, %c0_i32_0 : i32, i32
  }
  func.func @transform_2(%arg0: i32) -> (i32, i32) {
    %c0_i32 = arith.constant 0 : i32
    %c0_i32_0 = arith.constant 0 : i32
    %c0_i32_1 = arith.constant 0 : i32
    return %c0_i32, %c0_i32_0 : i32, i32
  }
  func.func @transform_3(%arg0: i32) -> (i32, i32) {
    %c0_i32 = arith.constant 0 : i32
    %c0_i32_0 = arith.constant 0 : i32
    %c0_i32_1 = arith.constant 0 : i32
    return %c0_i32, %c0_i32_0 : i32, i32
  }
  func.func @transform_4(%arg0: i32) -> (i32, i32) {
    %c0_i32 = arith.constant 0 : i32
    %c0_i32_0 = arith.constant 0 : i32
    %c0_i32_1 = arith.constant 0 : i32
    return %c0_i32, %c0_i32_0 : i32, i32
  }
  func.func @transform_5(%arg0: i32) -> (i32, i32) {
    %c0_i32 = arith.constant 0 : i32
    %c0_i32_0 = arith.constant 0 : i32
    %c0_i32_1 = arith.constant 0 : i32
    return %c0_i32, %c0_i32_0 : i32, i32
  }
  func.func @transform_6(%arg0: i32) -> (i32, i32) {
    %c0_i32 = arith.constant 0 : i32
    %c0_i32_0 = arith.constant 0 : i32
    %c0_i32_1 = arith.constant 0 : i32
    return %c0_i32, %c0_i32_0 : i32, i32
  }
  func.func @transform_7(%arg0: i32) -> (i32, i32) {
    %c0_i32 = arith.constant 0 : i32
    %c0_i32_0 = arith.constant 0 : i32
    %c0_i32_1 = arith.constant 0 : i32
    return %c0_i32, %c0_i32_0 : i32, i32
  }
  func.func @transform_8(%arg0: i32) -> (i32, i32) {
    %c0_i32 = arith.constant 0 : i32
    %c0_i32_0 = arith.constant 0 : i32
    %c0_i32_1 = arith.constant 0 : i32
    return %c0_i32, %c0_i32_0 : i32, i32
  }
  func.func @transform_9(%arg0: i32) -> (i32, i32) {
    %c0_i32 = arith.constant 0 : i32
    %c0_i32_0 = arith.constant 0 : i32
    %c0_i32_1 = arith.constant 0 : i32
    return %c0_i32, %c0_i32_0 : i32, i32
  }
  func.func @transform_10(%arg0: i32) -> (i32, i32) {
    %c0_i32 = arith.constant 0 : i32
    %c0_i32_0 = arith.constant 0 : i32
    %c0_i32_1 = arith.constant 0 : i32
    return %c0_i32, %c0_i32_0 : i32, i32
  }
  func.func @transform_11(%arg0: i32) -> (i32, i32, i32) {
    %c0_i32 = arith.constant 0 : i32
    %c0_i32_0 = arith.constant 0 : i32
    %c0_i32_1 = arith.constant 0 : i32
    return %arg0, %c0_i32, %c0_i32_0 : i32, i32, i32
  }
}

</mosaic_0001>

<bundles_post_ra>
// kernel: tpu_custom_call.1
= control target key start
LH: loop header
LB: loop body
LE: loop exit
PB: predicated region body
PF: predicated region fallthrough
CT: control target
= control target key end

     0   :  { %16 = vsyncpa [#allocation3], 0  ;;  %s2643_s0 = inlined_call_operand.vmem [shape: f32[2,8,384], index: 0, kind: input, shape index: {}]   ;;  %s2644_s1 = inlined_call_operand.vmem [shape: f32[8,6], index: 1, kind: input, shape index: {}]   ;;  %s2645_s2 = inlined_call_operand.vmem [shape: bf16[16,8], index: 2, kind: input, shape index: {}]   ;;  %s2646_s3 = inlined_call_operand.vmem [shape: f32[16,1], index: 3, kind: input, shape index: {}]   ;;  %s2647_s4 = inlined_call_operand.vmem [shape: f32[8,2], index: 4, kind: input, shape index: {}]   ;;  %s2648_s5 = inlined_call_operand.hbm [shape: bf16[384,384], index: 5, kind: input, shape index: {}]   ;;  %s2649_s6 = inlined_call_operand.vmem [shape: f32[1,384], index: 6, kind: input, shape index: {}]   ;;  %s2650_s7 = inlined_call_operand.vmem [shape: bf16[8,8], index: 7, kind: input, shape index: {}]   ;;  %s2651_s8 = inlined_call_operand.vmem [shape: bf16[32,8], index: 8, kind: input, shape index: {}]   ;;  %s2652_s9 = inlined_call_operand.vmem [shape: f32[32,1], index: 9, kind: input, shape index: {}]   ;;  %s2653_s10 = inlined_call_operand.vmem [shape: bf16[8,32], index: 10, kind: input, shape index: {}]   ;;  %s2654_s11 = inlined_call_operand.hbm [shape: f32[2,8,384], index: 11, kind: output, shape index: {}]  }
   0x1   :  { %17 = vsyncpa [#allocation4], 0 }
   0x2   :  { %19 = vsyncpa [#allocation4 + $0x1], 0  ;;  %s2366_s17 = smov 0   ;;  %s2368_s18 = smov 0  }
   0x3   :  { %s2370_s19 = smov 0   ;;  %s2372_s20 = smov 0  }
   0x4 LB: > { %s2387_s21 = sadd.s32 4294967295, %s2292_s20   ;;  %s1790_s22 = sadd.s32 4294967294, %s2292_s20   ;;  %s2292_s20 = sphi %s2372_s20, %s2672_s20   ;;  %s2288_s19 = sphi %s2370_s19, %s2671_s19   ;;  %s2284_s18 = sphi %s2368_s18, %s2670_s18   ;;  %s2280_s17 = sphi %s2366_s17, %s2669_s17  }
   0x5   : > { %s2391_s23 = sadd.s32 1, %s2292_s20   ;;  %s268_s24 = sadd.s32 1, %s2288_s19 }
   0x6   : > { %s265_s25 = ssub.s32 %s2292_s20, %s2391_s23  ;;  %p278_p0 = scmp.ne.s32.totalorder %s2288_s19, %s2284_s18 }
   0x7   : > { %p266_p1 = scmp.eq.s32.totalorder %s265_s25, 0  ;;  %p279_p2 = scmp.eq.s32.totalorder %s2387_s21, 1 }
   0x8   : > { %p284_p3 = scmp.ne.s32.totalorder %s2284_s18, %s2280_s17  ;;  %p285_p4 = scmp.eq.s32.totalorder %s1790_s22, 1 }
   0x9   : > { %s2402_s26 = scalar_select %p266_p1, %s2288_s19, %s268_s24  }
   0xa   : > { %p2404_p5 = por %p279_p2, %p278_p0  ;;  %p2408_p6 = por %p285_p4, %p284_p3 }
   0xb   : > { %2658 = sst [smem:[#allocation8_spill]] %s2402_s26  ;;  %p1791_p7 = scmp.ge.s32.totalorder %s2292_s20, 1 }
   0xc   : > { %s2659_s27 = scalar_select %p2404_p5, 1, 0 }
   0xd   : > { %s2660_s28 = scalar_select %p2408_p6, 1, 0 }
   0xe   : > { %p292_p8 = scmp.lt.s32.totalorder %s2292_s20, 3  ;;  %p2655_p9 = scmp.eq.s32.totalorder %s2387_s21, 0 }
   0xf   : > { %s2294_s30 = smov [#allocation2]   ;;  %s2198_s16 = scalar_lea.hbm %s2648_s5, 9216 }
  0x10   : > { %p2415_p10 = pnand %p1791_p7, %p292_p8  ;;  %s316_s12 = sshll.u32 %s2294_s30, 4  ;;  %s317_s12 = int_to_ptr.vmem [resolvable:$true] %s316_s12 }
  0x11   : > { %p2199_p13 = scmp.ne.s32.totalorder %s2648_s5, %s2198_s16  ;;  %p2205_p3 = scmp.lt.u32.totalorder %s2198_s16, %s2648_s5 }
  0x12   : > { %s2661_s29 = scalar_select %p2415_p10, 1, 0 }
  0x13   : > { %p1991_p11 = pneg %p2415_p10 }
  0x15   : > { %p2423_p12 = pnand %p2655_p9, %p1991_p11 }
  0x17   : > { %p2200_p0 = pneg %p2423_p12 }
  0x19   : > { %p2201_p1 = pnand %p2200_p0, %p2199_p13 }
  0x1b   : > { %p2202_p2 = pneg %p2201_p1 }
  0x1d   : > { %p2207_p4 = pnand %p2205_p3, %p2202_p2 }
  0x1f   : > { %2210 = shalt.err (!%p2207_p4)
}
  0x20   : > { %s2211_s26 = scalar_lea.vmem %s317_s12, 9216  ;;  %p2219_p9 = scmp.lt.s32.totalorder %s317_s12, %s317_s12 }
  0x21   : > { %p2212_p7 = scmp.ne.s32.totalorder %s317_s12, %s2211_s26  ;;  %p2220_p6 = scmp.lt.s32.totalorder %s2211_s26, %s2211_s26 }
  0x23   : > { %p2214_p8 = pnand %p2212_p7, %p2200_p0  ;;  %p2221_p5 = por %p2220_p6, %p2219_p9 }
  0x25   : > { %p2215_p11 = pneg %p2214_p8 }
  0x27   : > { %p2222_p10 = pnand %p2221_p5, %p2215_p11 }
  0x29   : > { %2225 = shalt.err (!%p2222_p10)
}
  0x2a   : > { %s2295_s14 = smov 192   ;;  %s2296_s15 = smov 12  }
  0x2b   : > { %1994 = dma.hbm_to_vmem [thread:$0]  (!%p2423_p12), %s2648_s5, 9216, %s317_s12, [#allocation3], %s2295_s14, %s2295_s14, %s2296_s15  }
  0x2c   : > { %p2663_p13 = scmp.ne.s32.totalorder %s2661_s29, 0 }
  0x2d   : > { %p2664_p1 = scmp.eq.s32.totalorder (!%p2663_p13), %s2387_s21, 0 }
  0x2e   : > { %355 = sbr.rel (%p2663_p13) target bundleno = 1420 (0x58c), region = 64 }
  0x35   : > { %2271 = dma.done.wait (%p2664_p1), [#allocation3], 9216   ;;  %p2665_p0 = pmov %p2664_p1 }
  0x36   : > { %v2297_v0 = vmov 0   ;;  %v2455_v1 = vld [vmem:[%s2644_s1] sm:$0xff]  ;;  %v2298_v2 = vmov 1   ;;  %v2299_v3 = vmov 0.0   ;;  %vm2300_vm0 = vmmov 0   ;;  %v426_v4 = vld [vmem:[%s2646_s3 + $0x8] sm:$0xff] }
  0x37   : > { %2273 = vsyncadd (%p2665_p0), [#allocation3], 4294958080  ;;  %2045 = vset.pattern.permute.xlu0 %v2297_v0  ;;  %488 = vmatprep.mubr.bf16.mxu0 %v2297_v0  ;;  %v425_v5 = vld [vmem:[%s2646_s3] sm:$0xff]  ;;  %p395_p5 = scmp.lt.s32.totalorder %s2387_s21, 1  ;;  %vm446_vm1 = vcmask 1043456   ;;  %vm442_vm2 = vcmask 64512  }
  0x38   : > { %2047 = vset.pattern.permute.xlu1 %v2297_v0  ;;  %407 = vperm.xlu0 %2045, %v2455_v1   ;;  %v570_v6 = vld [vmem:[%s2647_s4] sm:$0xff]  ;;  %v2085_v22 = vld [vmem:[#allocation2 + $0xc8] ss:$12 sps:$4 sm:$0xff]   ;;  %v2064_v31 = vld [vmem:[#allocation2 + $0x30] ss:$12 sps:$4 sm:$0xff]   ;;  %vm1598_vm3 = vcmask 261120  }
  0x39   : > { %1929 = vmatprep.subr.bf16.mxu1 %v2299_v3  ;;  %1931 = vmatprep.mubr.msk.bf16.mxu1 %vm2300_vm0, %v2299_v3  ;;  %s396_s15 = scalar_select %p395_p5, %s2387_s21, 1  ;;  %v2060_v21 = vld [vmem:[#allocation2 + $0x4] ss:$12 sps:$4 sm:$0xff]   ;;  %v2058_v26 = vld [vmem:[#allocation2] ss:$12 sps:$4 sm:$0xff]  }
  0x3a   : > { %434 = vperm.xlu1 %2047, %v426_v4   ;;  %v2057_v25 = vld [vmem:[%s2645_s2] sm:$0xff]   ;;  %v2086_v27 = vld [vmem:[#allocation2 + $0x8] ss:$12 sps:$4 sm:$0xff]   ;;  %v2069_v32 = vld [vmem:[#allocation2 + $0x4c] ss:$12 sps:$4 sm:$0xff]   ;;  %s392_s26 = sand.u32 1, %s2284_s18  }
  0x3b   : > { %s1983_s22 = smul.u32 24, %s396_s15  ;;  %v2063_v28 = vld [vmem:[#allocation2 + $0x1c] ss:$12 sps:$4 sm:$0xff]   ;;  %v2061_v29 = vld [vmem:[#allocation2 + $0x18] ss:$12 sps:$4 sm:$0xff]   ;;  %p2666_p9 = scmp.ne.s32.totalorder %s2659_s27, 0 }
  0x3c   : > { %2046 = vset.pattern.permute.xlu0 %v2298_v2  ;;  %v2066_v30 = vld [vmem:[#allocation2 + $0x34] ss:$12 sps:$4 sm:$0xff]   ;;  %v2072_v34 = vld [vmem:[#allocation2 + $0x64] ss:$12 sps:$4 sm:$0xff]   ;;  %v2075_v36 = vld [vmem:[#allocation2 + $0x7c] ss:$12 sps:$4 sm:$0xff]  }
  0x3d   : > { %414 = vperm.xlu0 %2046, %v2455_v1   ;;  %s399_s13 = scalar_lea.vmem %s2643_s0, %s1983_s22  ;;  %v2067_v33 = vld [vmem:[#allocation2 + $0x48] ss:$12 sps:$4 sm:$0xff]   ;;  %v2070_v35 = vld [vmem:[#allocation2 + $0x60] ss:$12 sps:$4 sm:$0xff]   ;;  %v2073_v37 = vld [vmem:[#allocation2 + $0x78] ss:$12 sps:$4 sm:$0xff]  }
  0x3e   : > { %573 = vperm.xlu1 %2047, %v570_v6   ;;  %v2477_v8 = vld [vmem:[%s399_s13] sm:$0xff]  ;;  %v2479_v9 = vld [vmem:[%s399_s13 + $0x8] sm:$0xff]  ;;  %v2481_v10 = vld [vmem:[%s399_s13 + $0x10] sm:$0xff]  ;;  %s1982_s13 = smul.u32 24, %s392_s26  ;;  %s2305_s22 = smov [#allocation5]  }
  0x3f   : > { %v2078_v38 = vld [vmem:[#allocation2 + $0x94] ss:$12 sps:$4 sm:$0xff]   ;;  %v2076_v39 = vld [vmem:[#allocation2 + $0x90] ss:$12 sps:$4 sm:$0xff]   ;;  %v2081_v40 = vld [vmem:[#allocation2 + $0xac] ss:$12 sps:$4 sm:$0xff]  }
  0x40   : > { %v2079_v41 = vld [vmem:[#allocation2 + $0xa8] ss:$12 sps:$4 sm:$0xff]   ;;  %v2084_v42 = vld [vmem:[#allocation2 + $0xc4] ss:$12 sps:$4 sm:$0xff]   ;;  %v2082_v43 = vld [vmem:[#allocation2 + $0xc0] ss:$12 sps:$4 sm:$0xff]  }
  0x41   : > { %2049 = vset.pattern.permute.xlu0 %v2297_v0  ;;  %v2089_v44 = vld [vmem:[#allocation2 + $0xdc] ss:$12 sps:$4 sm:$0xff]   ;;  %v2090_v45 = vld [vmem:[#allocation2 + $0xe0] ss:$12 sps:$4 sm:$0xff]   ;;  %v2087_v46 = vld [vmem:[#allocation2 + $0xd8] ss:$12 sps:$4 sm:$0xff]  }
  0x42   : > { %429 = vperm.xlu0 %2049, %v425_v5   ;;  %2048 = vset.pattern.permute.xlu1 %v2298_v2  ;;  %v2091_v47 = vld [vmem:[#allocation2 + $0x20] ss:$12 sps:$4 sm:$0xff]   ;;  %v2095_v49 = vld [vmem:[#allocation2 + $0xf8] ss:$12 sps:$4 sm:$0xff]   ;;  %v2092_v50 = vld [vmem:[#allocation2 + $0xf0] ss:$12 sps:$4 sm:$0xff]  }
  0x43   : > { %580 = vperm.xlu1 %2048, %v570_v6   ;;  %v2094_v48 = vld [vmem:[#allocation2 + $0xf4] ss:$12 sps:$4 sm:$0xff]   ;;  %v2096_v51 = vld [vmem:[#allocation2 + $0x38] ss:$12 sps:$4 sm:$0xff]   ;;  %v2100_v53 = vld [vmem:[#allocation2 + $0x110] ss:$12 sps:$4 sm:$0xff]  }
  0x44   : > { %v2099_v52 = vld [vmem:[#allocation2 + $0x10c] ss:$12 sps:$4 sm:$0xff]   ;;  %v2097_v54 = vld [vmem:[#allocation2 + $0x108] ss:$12 sps:$4 sm:$0xff]   ;;  %v2101_v55 = vld [vmem:[#allocation2 + $0x50] ss:$12 sps:$4 sm:$0xff]  }
  0x45   : > { %v2104_v56 = vld [vmem:[#allocation2 + $0x124] ss:$12 sps:$4 sm:$0xff]   ;;  %v2105_v57 = vld [vmem:[#allocation2 + $0x128] ss:$12 sps:$4 sm:$0xff]   ;;  %v2102_v58 = vld [vmem:[#allocation2 + $0x120] ss:$12 sps:$4 sm:$0xff]  }
  0x46   : > { %v2106_v59 = vld [vmem:[#allocation2 + $0x68] ss:$12 sps:$4 sm:$0xff]   ;;  %v2110_v61 = vld [vmem:[#allocation2 + $0x140] ss:$12 sps:$4 sm:$0xff]   ;;  %v2107_v62 = vld [vmem:[#allocation2 + $0x138] ss:$12 sps:$4 sm:$0xff]  }
  0x47   : > { %v2109_v60 = vld [vmem:[#allocation2 + $0x13c] ss:$12 sps:$4 sm:$0xff]   ;;  %v2111_v63 = vld [vmem:[#allocation2 + $0x80] ss:$12 sps:$4 sm:$0xff]   ;;  %v2115_v4 = vld [vmem:[#allocation2 + $0x158] ss:$12 sps:$4 sm:$0xff]  }
  0x48   : > { %v2114_v2 = vld [vmem:[#allocation2 + $0x154] ss:$12 sps:$4 sm:$0xff]   ;;  %v2112_v5 = vld [vmem:[#allocation2 + $0x150] ss:$12 sps:$4 sm:$0xff]   ;;  %v2116_v6 = vld [vmem:[#allocation2 + $0x98] ss:$12 sps:$4 sm:$0xff]  }
  0x49   : > { %s1984_s29 = smul.u32 384, %s2387_s21  ;;  %s394_s12 = scalar_lea.vmem [#allocation5], %s1982_s13 }
  0x4a   : > { %s1719_s16 = sshll.u32 %s394_s12, 4  ;;  %s1705_s21 = scalar_lea.sflag [#allocation4], %s392_s26  ;;  %s2603_s16 = int_to_ptr.vmem [resolvable:$true] %s1719_s16 }
  0x4b   : > { %s2601_s14 = scalar_lea.hbm %s2654_s11, %s1984_s29  ;;  %s2226_s15 = scalar_lea.vmem %s2603_s16, 384 }
  0x4c   : > { %p2227_p6 = scmp.ne.s32.totalorder %s2603_s16, %s2226_s15  ;;  %s2230_s24 = sshll.u32 %s2305_s22, 4  ;;  %s2231_s24 = int_to_ptr.vmem [resolvable:$false] %s2230_s24 }
  0x4d   : > { %s2232_s13 = scalar_lea.vmem %s2231_s24, 768  ;;  %p2233_p2 = scmp.lt.s32.totalorder %s2603_s16, %s2231_s24 }
  0x4e   : > { %p2228_p10 = pnand %p2227_p6, %p2666_p9  ;;  %p2234_p3 = scmp.lt.s32.totalorder %s2232_s13, %s2226_s15 }
  0x50   : > { %p2229_p12 = pneg %p2228_p10  ;;  %p2235_p4 = por %p2234_p3, %p2233_p2 }
  0x52   : > { %p2236_p7 = pnand %p2235_p4, %p2229_p12 }
  0xb7   : > { %v408_v7 = vpop.permute.xlu0 %407 }
  0xb8   : > { %v410_v11 = vmul.f32 %v408_v7, %v2477_v8  ;;  %v411_v12 = vmul.f32 %v408_v7, %v2479_v9  ;;  %v412_v13 = vmul.f32 %v408_v7, %v2481_v10  ;;  %v2119_v7 = vld [vmem:[#allocation2 + $0x16c] ss:$12 sps:$4 sm:$0xff]  }
  0xbc   : > { %v415_v14 = vpop.permute.xlu0 %414 }
  0xbd   : > { %v418_v15 = vadd.f32 %v415_v14, %v411_v12  ;;  %v417_v16 = vadd.f32 %v415_v14, %v410_v11  ;;  %v419_v17 = vadd.f32 %v415_v14, %v412_v13  ;;  %v2120_v11 = vld [vmem:[#allocation2 + $0x170] ss:$12 sps:$4 sm:$0xff]   ;;  %v2117_v12 = vld [vmem:[#allocation2 + $0x168] ss:$12 sps:$4 sm:$0xff]  }
  0xbe   : > { %v2121_v13 = vld [vmem:[#allocation2 + $0xb0] ss:$12 sps:$4 sm:$0xff]  }
  0xbf   : > { %v423_v18 = vpack.c.bf16 %v418_v15, %v418_v15  ;;  %v422_v19 = vpack.c.bf16 %v417_v16, %v417_v16  ;;  %v424_v20 = vpack.c.bf16 %v419_v17, %v419_v17  ;;  %v2124_v14 = vld [vmem:[#allocation2 + $0x184] ss:$12 sps:$4 sm:$0xff]  }
  0xc1   : > { %1798 = vmatprep.subr.msk.bf16.mxu0 %vm446_vm1, %v423_v18  ;;  %v448_v23 = vsel %vm446_vm1, %v422_v19, 0  ;;  %v454_v24 = vsel %vm446_vm1, %v424_v20, 0 }
  0xc2   : > { %457 = vmatpush1.bf16.msra.mxu0 %v448_v23  ;;  %1930 = vmatpush3.bf16.msra.mxu1 %v454_v24 }
  0xc3   : > { %1086 = vmatprep.subr.bf16.mxu0 %v2060_v21  ;;  %1890 = vmatprep.subr.bf16.mxu1 %v2085_v22  ;;  %v435_v21 = vpop.permute.xlu1 %434 }
  0xc5   : > { %1799 = vmatmul.mubr.msk.bf16.vlgmr.msra.gmra.mrb[0].mxu0 %vm442_vm2, %v2057_v25  ;;  %1932 = vmatmul.mubr.msk.bf16.vlgmr.msra.gmra.mrb[0].mxu1 %vm442_vm2, %v2057_v25 }
  0xc6   : > { %1087 = vmatpush1.bf16.msra.mxu0 %v2058_v26  ;;  %1891 = vmatpush3.bf16.msra.mxu1 %v2086_v27 }
  0xc7   : > { %1088 = vmatprep.subr.bf16.mxu0 %v2063_v28  ;;  %1892 = vmatprep.subr.bf16.mxu1 %v2090_v45  ;;  %v2122_v45 = vld [vmem:[#allocation2 + $0x180] ss:$12 sps:$4 sm:$0xff]  }
  0xca   : > { %1089 = vmatpush1.bf16.msra.mxu0 %v2061_v29  ;;  %1893 = vmatpush3.bf16.msra.mxu1 %v2091_v47 }
  0xcb   : > { %1090 = vmatprep.subr.bf16.mxu0 %v2066_v30  ;;  %1894 = vmatprep.subr.bf16.mxu1 %v2095_v49  ;;  %v2126_v49 = vld [vmem:[#allocation2 + $0x198] ss:$12 sps:$4 sm:$0xff]  }
  0xce   : > { %1091 = vmatpush1.bf16.msra.mxu0 %v2064_v31  ;;  %1895 = vmatpush3.bf16.msra.mxu1 %v2096_v51  ;;  %v2501_v31 = vpop.permute.xlu1 %573  ;;  %v2132_v51 = vld [vmem:[#allocation2 + $0x1b4] ss:$12 sps:$4 sm:$0xff]  }
  0xcf   : > { %1092 = vmatprep.subr.bf16.mxu0 %v2069_v32  ;;  %1896 = vmatprep.subr.bf16.mxu1 %v2100_v53  ;;  %v2133_v53 = vld [vmem:[#allocation2 + $0x1b8] ss:$12 sps:$4 sm:$0xff]  }
  0xd2   : > { %1093 = vmatpush1.bf16.msra.mxu0 %v2067_v33  ;;  %1897 = vmatpush3.bf16.msra.mxu1 %v2101_v55  ;;  %v2134_v55 = vld [vmem:[#allocation2 + $0x1c8] ss:$12 sps:$4 sm:$0xff]  }
  0xd3   : > { %1094 = vmatprep.subr.bf16.mxu0 %v2072_v34  ;;  %1898 = vmatprep.subr.bf16.mxu1 %v2105_v57  ;;  %v2140_v57 = vld [vmem:[#allocation2 + $0x1e4] ss:$12 sps:$4 sm:$0xff]  }
  0xd6   : > { %1095 = vmatpush1.bf16.msra.mxu0 %v2070_v35  ;;  %1899 = vmatpush3.bf16.msra.mxu1 %v2106_v59  ;;  %v2138_v59 = vld [vmem:[#allocation2 + $0x1e0] ss:$12 sps:$4 sm:$0xff]  }
  0xd7   : > { %1096 = vmatprep.subr.bf16.mxu0 %v2075_v36  ;;  %1900 = vmatprep.subr.bf16.mxu1 %v2110_v61 }
  0xda   : > { %1097 = vmatpush1.bf16.msra.mxu0 %v2073_v37  ;;  %1901 = vmatpush3.bf16.msra.mxu1 %v2111_v63 }
  0xdb   : > { %1098 = vmatprep.subr.bf16.mxu0 %v2078_v38  ;;  %1902 = vmatprep.subr.bf16.mxu1 %v2115_v4  ;;  %v2504_v38 = vpop.permute.xlu1 %580  ;;  %v2145_v4 = vld [vmem:[#allocation2 + $0x200] ss:$12 sps:$4 sm:$0xff]  }
  0xde   : > { %1099 = vmatpush1.bf16.msra.mxu0 %v2076_v39  ;;  %1903 = vmatpush3.bf16.msra.mxu1 %v2116_v6  ;;  %v2148_v6 = vld [vmem:[#allocation2 + $0x214] ss:$12 sps:$4 sm:$0xff]  }
  0xdf   : > { %1100 = vmatprep.subr.bf16.mxu0 %v2081_v40  ;;  %1904 = vmatprep.subr.bf16.mxu1 %v2120_v11  ;;  %v2149_v11 = vld [vmem:[#allocation2 + $0x218] ss:$12 sps:$4 sm:$0xff]  }
  0xe2   : > { %1101 = vmatpush1.bf16.msra.mxu0 %v2079_v41  ;;  %1905 = vmatpush3.bf16.msra.mxu1 %v2121_v13  ;;  %v2152_v13 = vld [vmem:[#allocation2 + $0x22c] ss:$12 sps:$4 sm:$0xff]  }
  0xe3   : > { %1102 = vmatprep.subr.bf16.mxu0 %v2084_v42  ;;  %1935 = vmatprep.subr.bf16.mxu1 %v2299_v3 }
  0xe6   : > { %1103 = vmatpush1.bf16.msra.mxu0 %v2082_v43 }
  0xe7   : > { %1104 = vmatprep.subr.bf16.mxu0 %v2089_v44 }
  0xea   : > { %1105 = vmatpush1.bf16.msra.mxu0 %v2087_v46  ;;  %v2125_v46 = vld [vmem:[#allocation2 + $0x188] ss:$12 sps:$4 sm:$0xff]  }
  0xeb   : > { %1106 = vmatprep.subr.bf16.mxu0 %v2094_v48  ;;  %v2128_v48 = vld [vmem:[#allocation2 + $0x19c] ss:$12 sps:$4 sm:$0xff]  }
  0xee   : > { %1107 = vmatpush1.bf16.msra.mxu0 %v2092_v50  ;;  %v2129_v50 = vld [vmem:[#allocation2 + $0x1a0] ss:$12 sps:$4 sm:$0xff]  }
  0xef   : > { %1108 = vmatprep.subr.bf16.mxu0 %v2099_v52  ;;  %v2130_v52 = vld [vmem:[#allocation2 + $0x1b0] ss:$12 sps:$4 sm:$0xff]  }
  0xf2   : > { %1109 = vmatpush1.bf16.msra.mxu0 %v2097_v54  ;;  %v2136_v54 = vld [vmem:[#allocation2 + $0x1cc] ss:$12 sps:$4 sm:$0xff]  }
  0xf3   : > { %1110 = vmatprep.subr.bf16.mxu0 %v2104_v56  ;;  %v2137_v56 = vld [vmem:[#allocation2 + $0x1d0] ss:$12 sps:$4 sm:$0xff]  }
  0xf6   : > { %1111 = vmatpush1.bf16.msra.mxu0 %v2102_v58 }
  0xf7   : > { %1112 = vmatprep.subr.bf16.mxu0 %v2109_v60  ;;  %v2141_v60 = vld [vmem:[#allocation2 + $0x1e8] ss:$12 sps:$4 sm:$0xff]  }
  0xfa   : > { %1113 = vmatpush1.bf16.msra.mxu0 %v2107_v62  ;;  %v2144_v62 = vld [vmem:[#allocation2 + $0x1fc] ss:$12 sps:$4 sm:$0xff]  }
  0xfb   : > { %1114 = vmatprep.subr.bf16.mxu0 %v2114_v2  ;;  %v2142_v2 = vld [vmem:[#allocation2 + $0x1f8] ss:$12 sps:$4 sm:$0xff]  }
  0xfe   : > { %1115 = vmatpush1.bf16.msra.mxu0 %v2112_v5 }
  0xff   : > { %1116 = vmatprep.subr.bf16.mxu0 %v2119_v7  ;;  %v2146_v7 = vld [vmem:[#allocation2 + $0x210] ss:$12 sps:$4 sm:$0xff]  }
 0x102   : > { %1117 = vmatpush1.bf16.msra.mxu0 %v2117_v12 }
 0x103   : > { %1127 = vmatprep.subr.bf16.mxu0 %v2124_v14  ;;  %v2150_v14 = vld [vmem:[#allocation2 + $0x228] ss:$12 sps:$4 sm:$0xff]  }
 0x198   : > { %v2495_v15 = vpop.f32.mrb[0].mxu0  ;;  %v2497_v16 = vpop.f32.mrb[0].mxu1 }
 0x199   : > { %v2499_v17 = vpop.f32.mrb[1].mxu0  ;;  %v1933_v18 = vpop.f32.mrb[1].mxu1 }
 0x19a   : > { %v494_v19 = vpop.f32.mrb[2].mxu0  ;;  %v536_v20 = vpop.f32.mrb[2].mxu1  ;;  %v2153_v18 = vld [vmem:[#allocation2 + $0x230] ss:$12 sps:$4 sm:$0xff]  }
 0x19b   : > { %v495_v22 = vadd.f32 %v494_v19, %v435_v21  ;;  %v496_v23 = vpop.f32.mrb[3].mxu0  ;;  %v1934_v24 = vpop.f32.mrb[3].mxu1  ;;  %v537_v39 = vadd.f32 %v536_v20, %v435_v21 }
 0x19c   : > { %v497_v25 = vadd.f32 %v496_v23, %v435_v21  ;;  %v2301_v21 = vmov 4   ;;  %v2303_v23 = vmov 2  }
 0x19d   : > { %v549_v26 = vmul.f32 0.70710677, %v495_v22  ;;  %v543_v29 = vmul.f32 0.5, %v495_v22  ;;  %v551_v43 = vmul.f32 0.70710677, %v537_v39  ;;  %v545_v63 = vmul.f32 0.5, %v537_v39  ;;  %2050 = vset.pattern.permute.xlu1 %v2301_v21 }
 0x19e   : > { %v550_v27 = vmul.f32 0.70710677, %v497_v25  ;;  %v544_v34 = vmul.f32 0.5, %v497_v25  ;;  %v2302_v22 = vmov 3   ;;  %1256 = vperm.xlu1 %2050, %v2455_v1   ;;  %v685_v39 = vld [vmem:[%s2649_s6] sm:$0x7] }
 0x19f   : > { %2156 = verf.f32 %v549_v26  ;;  %2052 = vset.pattern.permute.xlu0 %v2302_v22  ;;  %v1376_v21 = vld [vmem:[%s2652_s9] sm:$0xff]  ;;  %v1378_v22 = vld [vmem:[%s2652_s9 + $0x10] sm:$0xff] }
 0x1a0   : > { %2158 = verf.f32 %v550_v27  ;;  %1363 = vperm.xlu0 %2052, %v2455_v1  }
 0x1a1   : > { %2160 = verf.f32 %v551_v43 }
 0x1a2   : > { %2051 = vset.pattern.permute.xlu1 %v2303_v23  ;;  %v1377_v23 = vld [vmem:[%s2652_s9 + $0x8] sm:$0xff] }
 0x1a3   : > { %1356 = vperm.xlu1 %2051, %v2455_v1  }
 0x1a4   : > { %2054 = vset.pattern.permute.xlu0 %v2297_v0 }
 0x1a5   : > { %1392 = vperm.xlu0 %2054, %v1378_v22  }
 0x1a7   : > { %2053 = vset.pattern.permute.xlu1 %v2297_v0 }
 0x1a8   : > { %1382 = vperm.xlu1 %2053, %v1376_v21  }
 0x1a9   : > { %v2157_v28 = vpop.eup %2156 }
 0x1aa   : > { %v561_v30 = vadd.f32 1.0, %v2157_v28  ;;  %v2159_v32 = vpop.eup %2158 }
 0x1ab   : > { %v562_v35 = vadd.f32 1.0, %v2159_v32  ;;  %v2161_v58 = vpop.eup %2160 }
 0x1ac   : > { %v567_v33 = vmul.f32 %v561_v30, %v543_v29  ;;  %v563_v61 = vadd.f32 1.0, %v2161_v58  ;;  %v430_v29 = vpop.permute.xlu0 %429  ;;  %1387 = vperm.xlu1 %2053, %v1377_v23  }
 0x1ad   : > { %v568_v37 = vmul.f32 %v562_v35, %v544_v34  ;;  %v491_v30 = vadd.f32 %v2495_v15, %v430_v29  ;;  %v493_v32 = vadd.f32 %v2499_v17, %v430_v29 }
 0x1ae   : > { %v576_v36 = vmul.f32 %v2501_v31, %v567_v33  ;;  %v569_v5 = vmul.f32 %v563_v61, %v545_v63 }
 0x1af   : > { %v577_v40 = vmul.f32 %v2501_v31, %v568_v37  ;;  %v546_v33 = vmul.f32 0.70710677, %v491_v30  ;;  %v547_v35 = vmul.f32 0.70710677, %v493_v32 }
 0x1b0   : > { %v583_v41 = vadd.f32 %v2504_v38, %v576_v36  ;;  %v578_v12 = vmul.f32 %v2501_v31, %v569_v5  ;;  %v534_v31 = vadd.f32 %v2497_v16, %v430_v29  ;;  %v687_v36 = vlaneseq }
 0x1b1   : > { %v584_v42 = vadd.f32 %v2504_v38, %v577_v40  ;;  %2162 = verf.f32 %v546_v33 }
 0x1b2   : > { %v586_v47 = vpack.c.bf16 %v583_v41, %v583_v41  ;;  %v585_v19 = vadd.f32 %v2504_v38, %v578_v12  ;;  %v548_v34 = vmul.f32 0.70710677, %v534_v31  ;;  %v688_v37 = vshrl.u32 %v687_v36, 7 }
 0x1b3   : > { %v587_v44 = vpack.c.bf16 %v584_v42, %v584_v42 }
 0x1b4   : > { %v588_v20 = vpack.c.bf16 %v585_v19, %v585_v19  ;;  %2164 = verf.f32 %v548_v34  ;;  %v697_v38 = vsub.s32 2, %v688_v37  ;;  %v689_v41 = vsub.s32 0, %v688_v37 }
 0x1b5   : > { %1118 = vmatprep.mubr.bf16.mxu0 %v587_v44  ;;  %1200 = vmatprep.mubr.bf16.mxu1 %v587_v44  ;;  %2166 = verf.f32 %v547_v35  ;;  %v693_v42 = vsub.s32 1, %v688_v37  ;;  %v542_v44 = vmul.f32 0.5, %v534_v31 }
 0x1b6   : > { %1119 = vmatmul.mubr.bf16.vlgmr.msra.gmra.mrb[4].mxu0 %v586_v47  ;;  %1201 = vmatmul.mubr.bf16.vlgmr.msra.gmra.mrb[4].mxu1 %v586_v47  ;;  %v698_v43 = vrot.slane %v685_v39, %v697_v38 }
 0x1b7   : > { %1128 = vmatpush1.bf16.msra.mxu0 %v2122_v45  ;;  %1936 = vmatpush3.bf16.msra.mxu1 %v2125_v46  ;;  %v690_v46 = vrot.slane %v685_v39, %v689_v41 }
 0x1b8   : > { %1129 = vmatprep.subr.bf16.mxu0 %v2128_v48  ;;  %1937 = vmatprep.subr.bf16.mxu1 %v2299_v3  ;;  %v694_v48 = vrot.slane %v685_v39, %v693_v42 }
 0x1b9   : > { %1159 = vmatprep.mubr.bf16.mxu0 %v2297_v0  ;;  %1951 = vmatprep.mubr.msk.bf16.mxu1 %vm2300_vm0, %v2299_v3 }
 0x1bb   : > { %1130 = vmatpush1.bf16.msra.mxu0 %v2126_v49  ;;  %1938 = vmatpush3.bf16.msra.mxu1 %v2129_v50  ;;  %v2163_v40 = vpop.eup %2162  ;;  %v540_v49 = vmul.f32 0.5, %v491_v30 }
 0x1bc   : > { %1131 = vmatprep.subr.bf16.mxu0 %v2132_v51  ;;  %1939 = vmatprep.subr.bf16.mxu1 %v2299_v3  ;;  %v558_v17 = vadd.f32 1.0, %v2163_v40  ;;  %v541_v51 = vmul.f32 0.5, %v493_v32 }
 0x1be   : > { %v2165_v15 = vpop.eup %2164 }
 0x1bf   : > { %1132 = vmatpush1.bf16.msra.mxu0 %v2130_v52  ;;  %1940 = vmatpush3.bf16.msra.mxu1 %v2133_v53  ;;  %v2167_v16 = vpop.eup %2166  ;;  %v560_v45 = vadd.f32 1.0, %v2165_v15 }
 0x1c0   : > { %1133 = vmatprep.subr.bf16.mxu0 %v2136_v54  ;;  %1941 = vmatprep.subr.bf16.mxu1 %v2299_v3  ;;  %v559_v47 = vadd.f32 1.0, %v2167_v16  ;;  %v564_v54 = vmul.f32 %v558_v17, %v540_v49 }
 0x1c3   : > { %1134 = vmatpush1.bf16.msra.mxu0 %v2134_v55  ;;  %1942 = vmatpush3.bf16.msra.mxu1 %v2137_v56  ;;  %v566_v56 = vmul.f32 %v560_v45, %v542_v44 }
 0x1c4   : > { %1135 = vmatprep.subr.bf16.mxu0 %v2140_v57  ;;  %1943 = vmatprep.subr.bf16.mxu1 %v2299_v3 }
 0x1c7   : > { %1136 = vmatpush1.bf16.msra.mxu0 %v2138_v59  ;;  %1944 = vmatpush3.bf16.msra.mxu1 %v2141_v60  ;;  %v565_v60 = vmul.f32 %v559_v47, %v541_v51 }
 0x1c8   : > { %1137 = vmatprep.subr.bf16.mxu0 %v2144_v62  ;;  %1945 = vmatprep.subr.bf16.mxu1 %v2299_v3 }
 0x1cb   : > { %1138 = vmatpush1.bf16.msra.mxu0 %v2142_v2  ;;  %1946 = vmatpush3.bf16.msra.mxu1 %v2145_v4 }
 0x1cc   : > { %1139 = vmatprep.subr.bf16.mxu0 %v2148_v6  ;;  %1947 = vmatprep.subr.bf16.mxu1 %v2299_v3 }
 0x1cf   : > { %1140 = vmatpush1.bf16.msra.mxu0 %v2146_v7  ;;  %1948 = vmatpush3.bf16.msra.mxu1 %v2149_v11 }
 0x1d0   : > { %1141 = vmatprep.subr.bf16.mxu0 %v2152_v13  ;;  %1949 = vmatprep.subr.bf16.mxu1 %v2299_v3 }
 0x1d3   : > { %1142 = vmatpush1.bf16.msra.mxu0 %v2150_v14  ;;  %1950 = vmatpush3.bf16.msra.mxu1 %v2153_v18  ;;  %v1251_v18 = vld [vmem:[%s2650_s7] sm:$0xf] }
 0x1d6   : > { %1160 = vmatmul.mubr.bf16.vlgmr.msra.gmra.mrb[4].mxu0 %v588_v20  ;;  %1952 = vmatmul.mubr.bf16.vlgmr.msra.gmra.mrb[8].mxu1 %v588_v20  ;;  %v2154_v20 = vld [vmem:[%s2651_s8] sm:$0xff]  }
 0x1d7   : > { %1303 = vmatprep.mubr.bf16.mxu1 %v2297_v0  ;;  %1963 = vmatprep.mubr.msk.bf16.mxu0 %vm442_vm2, %v2154_v20 }
 0x21f   : > { %v1364_v35 = vpop.permute.xlu0 %1363 }
 0x289   : > { %v1906_v24 = vpop.f32.mrb[4].mxu1 }
 0x28a   : > { %v1907_v25 = vpop.f32.mrb[5].mxu1 }
 0x28b   : > { %v1908_v26 = vadd.f32 %v1907_v25, %v1906_v24  ;;  %v1909_v27 = vpop.f32.mrb[6].mxu1  ;;  %v1379_v24 = vld [vmem:[%s2652_s9 + $0x18] sm:$0xff]  ;;  %v1257_v25 = vpop.permute.xlu1 %1256 }
 0x28c   : > { %v1910_v28 = vpop.f32.mrb[7].mxu1  ;;  %1397 = vperm.xlu1 %2053, %v1379_v24  }
 0x28d   : > { %v1203_v50 = vadd.f32 %v1908_v26, %v698_v43 }
 0x28f   : > { %v1357_v31 = vpop.permute.xlu1 %1356 }
 0x293   : > { %v1383_v49 = vpop.permute.xlu1 %1382 }
 0x297   : > { %v1388_v51 = vpop.permute.xlu1 %1387 }
 0x2a9   : > { %v1161_v52 = vpop.f32.mrb[4].mxu0  ;;  %v1242_v53 = vpop.f32.mrb[8].mxu1 }
 0x2aa   : > { %v1975_v55 = vadd.f32 %v1161_v52, %v690_v46  ;;  %v1243_v57 = vadd.f32 %v1242_v53, %v1203_v50  ;;  %v1163_v58 = vpop.f32.mrb[5].mxu0  ;;  %v1953_v59 = vpop.f32.mrb[9].mxu1 }
 0x2ab   : > { %v1976_v61 = vadd.f32 %v1163_v58, %v694_v48  ;;  %v1165_v62 = vpop.f32.mrb[6].mxu0  ;;  %v1245_v63 = vpop.f32.mrb[10].mxu1  ;;  %v2304_v48 = vmov 5  }
 0x2ac   : > { %v1248_v2 = vmul.f32 %v1975_v55, %v564_v54  ;;  %v1250_v4 = vmul.f32 %v1243_v57, %v566_v56  ;;  %v1166_v5 = vpop.f32.mrb[7].mxu0  ;;  %v1954_v6 = vpop.f32.mrb[11].mxu1  ;;  %2055 = vset.pattern.permute.xlu1 %v2304_v48  ;;  %2056 = vset.pattern.permute.xlu0 %v2304_v48 }
 0x2ad   : > { %v1249_v7 = vmul.f32 %v1976_v61, %v565_v60  ;;  %1595 = vperm.xlu1 %2055, %v2455_v1  }
 0x2ae   : > { %v1252_v11 = vpack.c.bf16 %v1248_v2, %v1248_v2  ;;  %v1254_v14 = vpack.c.bf16 %v1250_v4, %v1250_v4 }
 0x2af   : > { %v1253_v12 = vpack.c.bf16 %v1249_v7, %v1249_v7 }
 0x2b0   : > { %v1263_v13 = vsel %vm446_vm1, %v1252_v11, 0  ;;  %v1269_v19 = vsel %vm446_vm1, %v1254_v14, 0 }
 0x2b1   : > { %1873 = vmatprep.subr.msk.bf16.mxu1 %vm446_vm1, %v1253_v12 }
 0x2b2   : > { %1272 = vmatpush1.bf16.msra.mxu1 %v1263_v13 }
 0x2b3   : > { %1955 = vmatprep.subr.bf16.mxu1 %v2299_v3 }
 0x2b5   : > { %1874 = vmatmul.mubr.msk.bf16.vlgmr.msra.gmra.mrb[12].mxu1 %vm442_vm2, %v1251_v18 }
 0x2b6   : > { %1956 = vmatpush3.bf16.msra.mxu1 %v1269_v19  ;;  %1957 = vmatprep.mubr.msk.bf16.mxu1 %vm2300_vm0, %v2299_v3 }
 0x2bd   : > { %1958 = vmatmul.mubr.msk.bf16.vlgmr.msra.gmra.mrb[16].mxu1 %vm442_vm2, %v1251_v18 }
 0x2be   : > { %1457 = vmatprep.mubr.bf16.mxu1 %v2297_v0 }
 0x30b   : > { %v1398_v63 = vpop.permute.xlu1 %1397 }
 0x388   : > { %v1305_v26 = vpop.f32.mrb[12].mxu1 }
 0x389   : > { %v1306_v27 = vadd.f32 %v1305_v26, %v1257_v25  ;;  %v1307_v28 = vpop.f32.mrb[13].mxu1 }
 0x38a   : > { %v1308_v29 = vadd.f32 %v1307_v28, %v1257_v25  ;;  %v1309_v30 = vpop.f32.mrb[14].mxu1 }
 0x38b   : > { %v2562_v32 = vadd.f32 %v1306_v27, %v2477_v8  ;;  %v1310_v33 = vpop.f32.mrb[15].mxu1 }
 0x38c   : > { %v2565_v34 = vadd.f32 %v1308_v29, %v2479_v9 }
 0x38d   : > { %v1359_v36 = vmul.f32 %v1357_v31, %v2562_v32 }
 0x38e   : > { %v1360_v37 = vmul.f32 %v1357_v31, %v2565_v34 }
 0x38f   : > { %v1366_v38 = vadd.f32 %v1364_v35, %v1359_v36 }
 0x390   : > { %v1367_v39 = vadd.f32 %v1364_v35, %v1360_v37  ;;  %v1346_v40 = vpop.f32.mrb[16].mxu1 }
 0x391   : > { %v1373_v41 = vpack.c.bf16 %v1366_v38, %v1366_v38  ;;  %v1347_v15 = vadd.f32 %v1346_v40, %v1257_v25  ;;  %v1959_v42 = vpop.f32.mrb[17].mxu1 }
 0x392   : > { %v1374_v16 = vpack.c.bf16 %v1367_v39, %v1367_v39  ;;  %v1349_v43 = vpop.f32.mrb[18].mxu1 }
 0x393   : > { %v2570_v8 = vadd.f32 %v1347_v15, %v2481_v10  ;;  %v1960_v17 = vpop.f32.mrb[19].mxu1  ;;  %v1417_v9 = vsel %vm446_vm1, %v1373_v41, 0  ;;  %v2155_v10 = vld [vmem:[%s2651_s8 + $0x8] sm:$0xff]  }
 0x394   : > { %1878 = vmatprep.subr.msk.bf16.mxu1 %vm446_vm1, %v1374_v16 }
 0x395   : > { %v1361_v44 = vmul.f32 %v1357_v31, %v2570_v8  ;;  %1426 = vmatpush1.bf16.msra.mxu1 %v1417_v9 }
 0x397   : > { %v1368_v45 = vadd.f32 %v1364_v35, %v1361_v44 }
 0x398   : > { %1879 = vmatmul.mubr.msk.bf16.vlgmr.msra.gmra.mrb[20].mxu1 %vm442_vm2, %v2154_v20 }
 0x399   : > { %v1375_v46 = vpack.c.bf16 %v1368_v45, %v1368_v45  ;;  %1467 = vmatprep.mubr.bf16.mxu1 %v2297_v0 }
 0x39b   : > { %1981 = vmatprep.subr.msk.bf16.mxu0 %vm446_vm1, %v1375_v46  ;;  %v1423_v47 = vsel %vm446_vm1, %v1375_v46, 0 }
 0x39c   : > { %1962 = vmatpush3.bf16.msra.mxu0 %v1423_v47 }
 0x39d   : > { %1967 = vmatprep.subr.bf16.mxu0 %v2299_v3 }
 0x39f   : > { %1964 = vmatmul.mubr.msk.bf16.vlgmr.msra.gmra.mrb[8].mxu0 %vm442_vm2, %v2155_v10 }
 0x3a0   : > { %1880 = vmatmul.mubr.msk.bf16.gmra.mrb[24].mxu1 %vm442_vm2, %v2155_v10  ;;  %1971 = vmatprep.mubr.msk.bf16.mxu0 %vm2300_vm0, %v2299_v3 }
 0x3a1   : > { %1634 = vmatprep.mubr.bf16.mxu1 %v2297_v0  ;;  %v1393_v0 = vpop.permute.xlu0 %1392 }
 0x46b   : > { %v1459_v50 = vpop.f32.mrb[20].mxu1 }
 0x46c   : > { %v1460_v52 = vadd.f32 %v1459_v50, %v1383_v49  ;;  %v1461_v53 = vpop.f32.mrb[21].mxu1 }
 0x46d   : > { %v1462_v54 = vadd.f32 %v1461_v53, %v1383_v49  ;;  %v1463_v55 = vpop.f32.mrb[22].mxu1 }
 0x46e   : > { %v1539_v56 = vmul.f32 0.70710677, %v1460_v52  ;;  %v1464_v57 = vadd.f32 %v1463_v55, %v1388_v51  ;;  %v1465_v58 = vpop.f32.mrb[23].mxu1  ;;  %v1527_v40 = vmul.f32 0.5, %v1460_v52 }
 0x46f   : > { %v1540_v59 = vmul.f32 0.70710677, %v1462_v54  ;;  %v1466_v60 = vadd.f32 %v1465_v58, %v1388_v51  ;;  %v1528_v42 = vmul.f32 0.5, %v1462_v54 }
 0x470   : > { %2168 = verf.f32 %v1539_v56  ;;  %v1542_v61 = vmul.f32 0.70710677, %v1464_v57  ;;  %v1530_v41 = vmul.f32 0.5, %v1464_v57 }
 0x471   : > { %2170 = verf.f32 %v1540_v59  ;;  %v1543_v62 = vmul.f32 0.70710677, %v1466_v60  ;;  %v1531_v16 = vmul.f32 0.5, %v1466_v60 }
 0x472   : > { %2172 = verf.f32 %v1542_v61  ;;  %v1965_v1 = vpop.f32.mrb[8].mxu0 }
 0x473   : > { %2174 = verf.f32 %v1543_v62  ;;  %v1521_v2 = vadd.f32 %v1965_v1, %v1393_v0  ;;  %v1469_v4 = vpop.f32.mrb[24].mxu1  ;;  %v1512_v5 = vpop.f32.mrb[9].mxu0 }
 0x474   : > { %v1470_v6 = vadd.f32 %v1469_v4, %v1393_v0  ;;  %v1513_v7 = vadd.f32 %v1512_v5, %v1383_v49  ;;  %v1471_v11 = vpop.f32.mrb[25].mxu1  ;;  %v1966_v12 = vpop.f32.mrb[10].mxu0 }
 0x475   : > { %v1547_v13 = vmul.f32 0.70710677, %v1521_v2  ;;  %v1472_v14 = vadd.f32 %v1471_v11, %v1393_v0  ;;  %v1524_v18 = vadd.f32 %v1966_v12, %v1398_v63  ;;  %v1473_v19 = vpop.f32.mrb[26].mxu1  ;;  %v1515_v20 = vpop.f32.mrb[11].mxu0  ;;  %v1535_v53 = vmul.f32 0.5, %v1521_v2 }
 0x476   : > { %v1545_v21 = vmul.f32 0.70710677, %v1470_v6  ;;  %v1541_v22 = vmul.f32 0.70710677, %v1513_v7  ;;  %v1475_v24 = vpop.f32.mrb[27].mxu1  ;;  %v1474_v26 = vadd.f32 %v1473_v19, %v1398_v63  ;;  %v1516_v27 = vadd.f32 %v1515_v20, %v1388_v51 }
 0x477   : > { %2176 = verf.f32 %v1547_v13  ;;  %v1546_v23 = vmul.f32 0.70710677, %v1472_v14  ;;  %v1550_v25 = vmul.f32 0.70710677, %v1524_v18  ;;  %v1476_v28 = vadd.f32 %v1475_v24, %v1398_v63 }
 0x478   : > { %2178 = verf.f32 %v1545_v21  ;;  %v1548_v30 = vmul.f32 0.70710677, %v1474_v26  ;;  %v1544_v35 = vmul.f32 0.70710677, %v1516_v27  ;;  %v1533_v55 = vmul.f32 0.5, %v1470_v6 }
 0x479   : > { %2180 = verf.f32 %v1541_v22  ;;  %v1549_v38 = vmul.f32 0.70710677, %v1476_v28  ;;  %v1529_v57 = vmul.f32 0.5, %v1513_v7  ;;  %v1538_v59 = vmul.f32 0.5, %v1524_v18 }
 0x47a   : > { %v2169_v29 = vpop.eup %2168  ;;  %2182 = verf.f32 %v1546_v23  ;;  %v1534_v0 = vmul.f32 0.5, %v1472_v14  ;;  %v1536_v63 = vmul.f32 0.5, %v1474_v26  ;;  %v1532_v12 = vmul.f32 0.5, %v1516_v27  ;;  %v1587_v26 = vld [vmem:[%s2653_s10] sm:$0xf]  ;;  %v1596_v27 = vpop.permute.xlu1 %1595 }
 0x47b   : > { %v2171_v31 = vpop.eup %2170  ;;  %v1563_v33 = vadd.f32 1.0, %v2169_v29  ;;  %2184 = verf.f32 %v1550_v25  ;;  %v1537_v6 = vmul.f32 0.5, %v1476_v28 }
 0x47c   : > { %v2173_v36 = vpop.eup %2172  ;;  %v1564_v37 = vadd.f32 1.0, %v2171_v31  ;;  %2186 = verf.f32 %v1548_v30 }
 0x47d   : > { %v2175_v39 = vpop.eup %2174  ;;  %v1566_v15 = vadd.f32 1.0, %v2173_v36  ;;  %2188 = verf.f32 %v1544_v35  ;;  %v1575_v17 = vmul.f32 %v1563_v33, %v1527_v40 }
 0x47e   : > { %v1567_v43 = vadd.f32 1.0, %v2175_v39  ;;  %2190 = verf.f32 %v1549_v38  ;;  %v1576_v44 = vmul.f32 %v1564_v37, %v1528_v42 }
 0x47f   : > { %v1578_v9 = vmul.f32 %v1566_v15, %v1530_v41 }
 0x480   : > { %v1579_v45 = vmul.f32 %v1567_v43, %v1531_v16 }
 0x481   : > { %v2177_v46 = vpop.eup %2176  ;;  %v1588_v47 = vpack.c.bf16 %v1578_v9, %v1575_v17 }
 0x482   : > { %v2179_v10 = vpop.eup %2178  ;;  %v1589_v48 = vpack.c.bf16 %v1579_v45, %v1576_v44  ;;  %v1571_v51 = vadd.f32 1.0, %v2177_v46 }
 0x483   : > { %v2181_v49 = vpop.eup %2180  ;;  %v1569_v56 = vadd.f32 1.0, %v2179_v10 }
 0x484   : > { %v2183_v50 = vpop.eup %2182  ;;  %1602 = vmatprep.subr.bf16.mxu1 %v1589_v48  ;;  %v1565_v58 = vadd.f32 1.0, %v2181_v49  ;;  %v1583_v5 = vmul.f32 %v1571_v51, %v1535_v53 }
 0x485   : > { %v2185_v52 = vpop.eup %2184  ;;  %1603 = vmatpush1.bf16.msra.mxu1 %v1588_v47  ;;  %v1570_v62 = vadd.f32 1.0, %v2183_v50  ;;  %v1581_v19 = vmul.f32 %v1569_v56, %v1533_v55 }
 0x486   : > { %v2187_v54 = vpop.eup %2186  ;;  %v1574_v60 = vadd.f32 1.0, %v2185_v52  ;;  %v1577_v21 = vmul.f32 %v1565_v58, %v1529_v57 }
 0x487   : > { %v2189_v61 = vpop.eup %2188  ;;  %v1572_v1 = vadd.f32 1.0, %v2187_v54  ;;  %v1582_v23 = vmul.f32 %v1570_v62, %v1534_v0 }
 0x488   : > { %v2191_v4 = vpop.eup %2190  ;;  %v1586_v11 = vmul.f32 %v1574_v60, %v1538_v59  ;;  %v1568_v13 = vadd.f32 1.0, %v2189_v61 }
 0x489   : > { %v1584_v2 = vmul.f32 %v1572_v1, %v1536_v63  ;;  %v1573_v20 = vadd.f32 1.0, %v2191_v4 }
 0x48a   : > { %v1593_v22 = vpack.c.bf16 %v1586_v11, %v1583_v5  ;;  %v1580_v7 = vmul.f32 %v1568_v13, %v1532_v12 }
 0x48b   : > { %v1591_v18 = vpack.c.bf16 %v1584_v2, %v1581_v19  ;;  %v1585_v24 = vmul.f32 %v1573_v20, %v1537_v6 }
 0x48c   : > { %v1590_v25 = vpack.c.bf16 %v1580_v7, %v1577_v21 }
 0x48d   : > { %v1592_v14 = vpack.c.bf16 %v1585_v24, %v1582_v23 }
 0x48e   : > { %1968 = vmatpush3.bf16.msra.mxu0 %v1590_v25 }
 0x48f   : > { %1604 = vmatprep.subr.bf16.mxu1 %v1592_v14  ;;  %1969 = vmatprep.subr.bf16.mxu0 %v2299_v3 }
 0x490   : > { %1605 = vmatpush1.bf16.msra.mxu1 %v1591_v18 }
 0x492   : > { %1970 = vmatpush3.bf16.msra.mxu0 %v1593_v22 }
 0x493   : > { %1883 = vmatmul.mubr.msk.bf16.vlgmr.msra.gmra.mrb[28].mxu1 %vm1598_vm3, %v1587_v26 }
 0x495   : > { %1972 = vmatmul.mubr.msk.bf16.vlgmr.msra.gmra.mrb[12].mxu0 %vm1598_vm3, %v1587_v26 }
 0x566   : > { %v1636_v28 = vpop.f32.mrb[28].mxu1 }
 0x567   : > { %v1637_v29 = vadd.f32 %v1636_v28, %v1596_v27  ;;  %v1638_v30 = vpop.f32.mrb[29].mxu1 }
 0x568   : > { %v1639_v31 = vadd.f32 %v1638_v30, %v1596_v27  ;;  %v1677_v33 = vpop.f32.mrb[12].mxu0  ;;  %v1640_v35 = vpop.f32.mrb[30].mxu1 }
 0x569   : > { %v1686_v36 = vmul.f32 0.70710677, %v1637_v29  ;;  %v1678_v37 = vadd.f32 %v1677_v33, %v1596_v27  ;;  %v1973_v3 = vpop.f32.mrb[13].mxu0  ;;  %v1641_v38 = vpop.f32.mrb[31].mxu1  ;;  %v1683_v43 = vmul.f32 0.5, %v1637_v29 }
 0x56a   : > { %v1687_v39 = vmul.f32 0.70710677, %v1639_v31  ;;  %v1680_v40 = vpop.f32.mrb[14].mxu0  ;;  %v1684_v44 = vmul.f32 0.5, %v1639_v31 }
 0x56b   : > { %2192 = verf.f32 %v1686_v36  ;;  %v1688_v41 = vmul.f32 0.70710677, %v1678_v37  ;;  %v1974_v15 = vpop.f32.mrb[15].mxu0  ;;  %v1685_v47 = vmul.f32 0.5, %v1678_v37 }
 0x56c   : > { %2194 = verf.f32 %v1687_v39 }
 0x56d   : > { %2196 = verf.f32 %v1688_v41 }
 0x575   : > { %v2193_v42 = vpop.eup %2192 }
 0x576   : > { %v2195_v16 = vpop.eup %2194  ;;  %v1692_v17 = vadd.f32 1.0, %v2193_v42 }
 0x577   : > { %v2197_v9 = vpop.eup %2196  ;;  %v1693_v45 = vadd.f32 1.0, %v2195_v16 }
 0x578   : > { %v1695_v46 = vmul.f32 %v1692_v17, %v1683_v43  ;;  %v1694_v10 = vadd.f32 1.0, %v2197_v9 }
 0x579   : > { %v1696_v48 = vmul.f32 %v1693_v45, %v1684_v44 }
 0x57a   : > { %v1698_v49 = vadd.f32 %v1695_v46, %v2562_v32  ;;  %v1697_v50 = vmul.f32 %v1694_v10, %v1685_v47 }
 0x57b   : > { %v1699_v51 = vadd.f32 %v1696_v48, %v2565_v34 }
 0x57c   : > { %1701 = vst [vmem:[%s394_s12] sm:$0xff] %v1698_v49  ;;  %v1700_v52 = vadd.f32 %v1697_v50, %v2570_v8 }
 0x57d   : > { %1702 = vst [vmem:[%s394_s12 + $0x8] sm:$0xff] %v1699_v51 }
 0x57e   : > { %1703 = vst [vmem:[%s394_s12 + $0x10] sm:$0xff] %v1700_v52 }
 0x57f   : > { %2239 = shalt.err (!%p2236_p7)
}
 0x580   : > { %s2240_s26 = scalar_lea.hbm %s2601_s14, 384  ;;  %s2244_s25 = scalar_lea.hbm %s2654_s11, 768 }
 0x581   : > { %p2241_p8 = scmp.ne.s32.totalorder %s2601_s14, %s2240_s26  ;;  %p2245_p1 = scmp.lt.u32.totalorder %s2601_s14, %s2654_s11 }
 0x582   : > { %p2246_p0 = scmp.lt.u32.totalorder %s2244_s25, %s2240_s26  ;;  %p2248_p6 = scmp.lt.u32.totalorder %s2240_s26, %s2601_s14 }
 0x583   : > { %p2242_p11 = pnand %p2241_p8, %p2666_p9 }
 0x584   : > { %p2247_p5 = por %p2246_p0, %p2245_p1 }
 0x585   : > { %p2243_p13 = pneg %p2242_p11 }
 0x586   : > { %p2249_p10 = por %p2248_p6, %p2247_p5 }
 0x588   : > { %p2250_p12 = pnand %p2249_p10, %p2243_p13 }
 0x58a   : > { %2253 = shalt.err (!%p2250_p12)
}
 0x58b   : > { %1989 = dma.vmem_to_hbm [thread:$0]  (%p2666_p9), %s2603_s16, 384, %s2601_s14, %s1705_s21  }
 0x58c PF: > { %p2001_p2 = scmp.ge.s32.totalorder %s2292_s20, 2  ;;  %s1731_s15 = sand.u32 1, %s2280_s17  }
 0x58d   : > { %p2667_p3 = scmp.ne.s32.totalorder %s2660_s28, 0  ;;  %s1732_s24 = scalar_lea.sflag [#allocation4], %s1731_s15 }
 0x58f   : > { %p1996_p4 = pnand %p2001_p2, %p2667_p3 }
 0x591   : > { %2275 = dma.done.wait (!%p1996_p4), %s1732_s24, 384  }
 0x592   : > { %2277 = vsyncadd (!%p1996_p4), %s1732_s24, 4294966912  ;;  %s2668_s13 = sld [smem:[#allocation8_spill]]  ;;  %p22_p7 = scmp.ge.s32.totalorder %s2391_s23, 4  }
 0x593   : > { %s2669_s17 = smov %s2284_s18  ;;  %s2670_s18 = smov %s2288_s19 }
 0x594   : > { %s2672_s20 = smov %s2391_s23  ;;  %24 = sbr.rel (!%p22_p7) target bundleno = 4 (0x4), region = 104 }
 0x598   : > { %s2671_s19 = smov %s2668_s13 }
 0x59b   :  { %1737 = vsyncpa [#allocation3], 1 }
 0x59c   :  { %1739 = vsyncpa [#allocation3 + $0x1], 1 }
 0x59d   :  { %1740 = vsyncpa [#allocation4], 1 }
 0x59e   :  { %1742 = vsyncpa [#allocation4 + $0x1], 1 }

</bundles_post_ra>
